<compile_context>
chip_gen: v7x
topology: tpu7x:2x2x1
jax: 0.10.0
libtpu: 0.0.40
codegen_flags: <defaults>
</compile_context>

<pallas_src>
import jax
import jax.numpy as jnp
import numpy as np
from jax.experimental import pallas as pl
from jax.experimental.pallas import tpu as pltpu

# ---- model hyper-parameters (mirror CSNNet.__init__) ------------------------
INPUT_SIZE = 16        # L  (input_size)
NUM_STEPS  = 8
BETA       = 0.9
NUM_OUT    = 2
C1, C2     = 8, 8      # conv1 / conv2 out_channels
K          = 3         # conv kernel size, stride 1, padding 1
THR1       = 1.5       # lif1 threshold
THR2       = 1.0       # lif2 threshold (snntorch default)
THRO       = 1.0       # lif_out threshold (snntorch default)
B          = 2         # batch

L   = INPUT_SIZE
L1  = L // 2           # after conv1 (same length) + max_pool1d(2)
L2  = L1 // 2          # after conv2 (same length) + max_pool1d(2)
F1  = C1 * L1          # 64  flat conv1 feature size (channel-major)
F2  = C2 * L2          # 32  flat conv2 feature size (channel-major)
LIN = F2               # flattened feature size fed to fc_out
TB  = NUM_STEPS * B    # 16  time-batched leading dim


def _im2col_pool_weight(w, l_in):
    """Dense im2col matrix for Conv1d(k=3, stride=1, pad=1) followed by
    max_pool1d(2), built at trace time (outside the kernel).

    w: (C_out, C_in, K). Returns (C_in*l_in, 2*C_out*(l_in//2)): the first /
    second column halves are the even / odd pool candidates; the zero boundary
    padding is baked in via masking.  Channel-major flat layouts on both sides
    (row = c_in*l_in + l_in_idx, col = half*C_out*Lp + c_out*Lp + p), matching
    torch's .view() flatten order.
    """
    c_out, c_in, kk = w.shape
    lp = l_in // 2
    ci, li, half, co, p = np.meshgrid(
        np.arange(c_in), np.arange(l_in), np.arange(2),
        np.arange(c_out), np.arange(lp), indexing="ij")
    l_out = 2 * p + half                       # pre-pool output position
    k = li - l_out + 1                         # tap index (padding = 1)
    valid = (k >= 0) & (k < kk)
    k_c = np.clip(k, 0, kk - 1)
    vals = jnp.where(jnp.asarray(valid), w[co, ci, k_c], 0.0)
    return vals.reshape(c_in * l_in, 2 * c_out * lp).astype(jnp.float32)


def csnn_kernel(x_ref, w1p_ref, b1f_ref, w2p_ref, b2f_ref, wfc_ref, bfc_ref,
                spk_out_ref, mem_out_ref):
    """Single invocation; all num_steps unrolled in-kernel.

    x_ref   : (B, L)          input (in_channels == 1, channel squeezed)
    w1p_ref : (L, 2*F1)       conv1 im2col+pool weight   (16, 128)
    b1f_ref : (1, F1)         conv1 bias, channel-major flat
    w2p_ref : (F1, 2*F2)      conv2 im2col+pool weight   (64, 64)
    b2f_ref : (1, F2)         conv2 bias, channel-major flat
    wfc_ref : (F2, NUM_OUT)   fc weight (transposed)
    bfc_ref : (1, NUM_OUT)
    outputs : (T*B, NUM_OUT)  output-layer spikes / membranes (flat slab)
    """
    x   = x_ref[...]
    w1p = w1p_ref[...]
    b1f = b1f_ref[...]
    w2p = w2p_ref[...]
    b2f = b2f_ref[...]
    wfc = wfc_ref[...]
    bfc = bfc_ref[...]

    # ---- conv1 + pool (time-invariant): single MXU matmul; pooling is the
    #      max of the even/odd column halves, bias added after the max. ------
    y1 = jnp.dot(x, w1p, preferred_element_type=jnp.float32)       # (B, 2*F1)
    cur1 = jnp.maximum(y1[:, :F1], y1[:, F1:]) + b1f                # (B, F1)

    # ---- lif1 recurrence (subtract-reset, reset from previous mem) ---------
    mem1 = jnp.zeros((B, F1), jnp.float32)
    spk1_list = []
    for _ in range(NUM_STEPS):
        rst = (mem1 > THR1).astype(jnp.float32)
        mem1 = BETA * mem1 + cur1 - rst * THR1
        spk1_list.append((mem1 > THR1).astype(jnp.float32))
    spk1_all = jnp.concatenate(spk1_list, axis=0)                   # (T*B, F1)

    # ---- conv2 + pool, batched over ALL time steps: one MXU matmul ---------
    y2 = jnp.dot(spk1_all, w2p, preferred_element_type=jnp.float32)  # (T*B, 2*F2)
    cur2_all = jnp.maximum(y2[:, :F2], y2[:, F2:]) + b2f             # (T*B, F2)

    # ---- lif2 recurrence (serial elementwise over precomputed cur2) --------
    mem2 = jnp.zeros((B, F2), jnp.float32)
    spk2_list = []
    for t in range(NUM_STEPS):
        cur2 = cur2_all[t * B:(t + 1) * B, :]
        rst = (mem2 > THR2).astype(jnp.float32)
        mem2 = BETA * mem2 + cur2 - rst * THR2
        spk2_list.append((mem2 > THR2).astype(jnp.float32))
    spk2_all = jnp.concatenate(spk2_list, axis=0)                    # (T*B, F2)

    # ---- fc_out, batched over all time steps: one MXU matmul ---------------
    cur_out_all = jnp.dot(spk2_all, wfc,
                          preferred_element_type=jnp.float32) + bfc  # (T*B, 2)

    # ---- lif_out recurrence; buffer results, single store at the end -------
    memo = jnp.zeros((B, NUM_OUT), jnp.float32)
    spko_list, memo_list = [], []
    for t in range(NUM_STEPS):
        c = cur_out_all[t * B:(t + 1) * B, :]
        rst = (memo > THRO).astype(jnp.float32)
        memo = BETA * memo + c - rst * THRO
        spko_list.append((memo > THRO).astype(jnp.float32))
        memo_list.append(memo)

    spk_out_ref[...] = jnp.concatenate(spko_list, axis=0)            # (T*B, 2)
    mem_out_ref[...] = jnp.concatenate(memo_list, axis=0)

    # TODO(synk): spike_grad (surrogate gradient) and learn_threshold only
    # affect the backward/training path; forward uses the exact Heaviside.


def csnn_forward(x_bl, params):
    """x_bl: (B, L) float32.  Returns (spk_out_rec, mem_out_rec): (T, B, 2)."""
    w1, b1, w2, b2, wfc_t, bfc = params
    # Trace-time weight prep (outside the kernel): im2col+pool matrices with
    # the boundary zeros baked in, and channel-major flat biases.
    w1p = _im2col_pool_weight(w1.reshape(C1, 1, K), L)   # (16, 128)
    w2p = _im2col_pool_weight(w2, L1)                    # (64, 64)
    b1f = jnp.repeat(b1[:, 0], L1)[None, :]              # (1, 64)
    b2f = jnp.repeat(b2[:, 0], L2)[None, :]              # (1, 32)

    vmem = pl.BlockSpec(memory_space=pltpu.MemorySpace.VMEM)
    spk_flat, mem_flat = pl.pallas_call(
        csnn_kernel,
        out_shape=(jax.ShapeDtypeStruct((TB, NUM_OUT), jnp.float32),
                   jax.ShapeDtypeStruct((TB, NUM_OUT), jnp.float32)),
        in_specs=[vmem] * 7,
        out_specs=(vmem, vmem),
    )(x_bl, w1p, b1f, w2p, b2f, wfc_t, bfc)
    return (spk_flat.reshape(NUM_STEPS, B, NUM_OUT),
            mem_flat.reshape(NUM_STEPS, B, NUM_OUT))


# ---- pure-JAX reference (independent formulation) for correctness -----------
def csnn_ref(x_bl, params):
    w1, b1, w2, b2, wfc_t, bfc = params
    mem1 = jnp.zeros((B, C1, L1), jnp.float32)
    mem2 = jnp.zeros((B, C2, L2), jnp.float32)
    memo = jnp.zeros((B, NUM_OUT), jnp.float32)

    xp = jnp.pad(x_bl, ((0, 0), (1, 1)))
    y1 = jnp.zeros((B, C1, L), jnp.float32) + b1[None, :, :]
    for k in range(K):
        y1 = y1 + w1[None, :, k, None] * xp[:, None, k:k + L]
    cur1 = jnp.max(y1.reshape(B, C1, L1, 2), axis=-1)

    spk_rec, mem_rec = [], []
    for _ in range(NUM_STEPS):
        rst1 = (mem1 > THR1).astype(jnp.float32)
        mem1 = BETA * mem1 + cur1 - rst1 * THR1
        spk1 = (mem1 > THR1).astype(jnp.float32)

        sp = jnp.pad(spk1, ((0, 0), (0, 0), (1, 1)))
        y2 = jnp.zeros((B, C2, L1), jnp.float32) + b2[None, :, :]
        for k in range(K):
            y2 = y2 + jnp.einsum('oc,bcl->bol', w2[:, :, k], sp[:, :, k:k + L1])
        cur2 = jnp.max(y2.reshape(B, C2, L2, 2), axis=-1)

        rst2 = (mem2 > THR2).astype(jnp.float32)
        mem2 = BETA * mem2 + cur2 - rst2 * THR2
        spk2 = (mem2 > THR2).astype(jnp.float32)

        cur_out = spk2.reshape(B, LIN) @ wfc_t + bfc
        rsto = (memo > THRO).astype(jnp.float32)
        memo = BETA * memo + cur_out - rsto * THRO
        spko = (memo > THRO).astype(jnp.float32)

        spk_rec.append(spko)
        mem_rec.append(memo)
    return jnp.stack(spk_rec, 0), jnp.stack(mem_rec, 0)


def init_params(key):
    ks = jax.random.split(key, 6)

    def xavier(k, shape, fan_in, fan_out):
        bound = float(np.sqrt(6.0 / (fan_in + fan_out)))
        return jax.random.uniform(k, shape, jnp.float32, -bound, bound)

    def unif(k, shape, bound):
        return jax.random.uniform(k, shape, jnp.float32, -bound, bound)

    # conv1: Conv1d(1, 8, 3), xavier_uniform_ weight, default bias init
    w1 = xavier(ks[0], (C1, K), fan_in=1 * K, fan_out=C1 * K)
    b1 = unif(ks[1], (C1, 1), 1.0 / np.sqrt(1 * K))
    # conv2: Conv1d(8, 8, 3), default (uniform) init
    w2 = unif(ks[2], (C2, C1, K), 1.0 / np.sqrt(C1 * K))
    b2 = unif(ks[3], (C2, 1), 1.0 / np.sqrt(C1 * K))
    # fc_out: Linear(LIN, NUM_OUT); stored transposed (LIN, NUM_OUT)
    wfc_t = xavier(ks[4], (LIN, NUM_OUT), fan_in=LIN, fan_out=NUM_OUT)
    bfc = unif(ks[5], (1, NUM_OUT), 1.0 / np.sqrt(LIN))
    return (w1, b1, w2, b2, wfc_t, bfc)


if __name__ == "__main__":
    key = jax.random.PRNGKey(0)
    kx, kp = jax.random.split(key)

    # PyTorch input layout is (B, in_channels=1, L); squeeze channel for kernel.
    x = jax.random.normal(kx, (B, 1, INPUT_SIZE), jnp.float32) * 2.0
    x_bl = x[:, 0, :]

    params = init_params(kp)

    spk_out, mem_out = csnn_forward(x_bl, params)
    jax.block_until_ready((spk_out, mem_out))

    spk_ref, mem_ref = csnn_ref(x_bl, params)
    mem_out_np, mem_ref_np = np.asarray(mem_out), np.asarray(mem_ref)
    spk_out_np, spk_ref_np = np.asarray(spk_out), np.asarray(spk_ref)

    np.testing.assert_allclose(mem_out_np, mem_ref_np, rtol=1e-4, atol=1e-4)
    # Spikes are a hard threshold of mem; only compare where the reference
    # membrane is comfortably away from the threshold (fp reassociation guard).
    safe = np.abs(mem_ref_np - THRO) > 1e-3
    np.testing.assert_array_equal(spk_out_np[safe], spk_ref_np[safe])

    assert spk_out.shape == (NUM_STEPS, B, NUM_OUT)
    assert mem_out.shape == (NUM_STEPS, B, NUM_OUT)

    print("KERNEL_OK")
</pallas_src>

<mosaic_0001>
module attributes {stable_mosaic.version = 11 : i64} {
  func.func @csnn_kernel(%arg0: memref<2x16xf32, #tpu.memory_space<vmem>>, %arg1: memref<16x128xf32, #tpu.memory_space<vmem>>, %arg2: memref<1x64xf32, #tpu.memory_space<vmem>>, %arg3: memref<64x64xf32, #tpu.memory_space<vmem>>, %arg4: memref<1x32xf32, #tpu.memory_space<vmem>>, %arg5: memref<32x2xf32, #tpu.memory_space<vmem>>, %arg6: memref<1x2xf32, #tpu.memory_space<vmem>>, %arg7: memref<16x2xf32, #tpu.memory_space<vmem>>, %arg8: memref<16x2xf32, #tpu.memory_space<vmem>>) attributes {dimension_semantics = [], scalar_prefetch = 0 : i64, scratch_operands = 0 : i64, tpu.core_type = #tpu.core_type<tc>} {
    %c0 = arith.constant 0 : index
    %c0_0 = arith.constant 0 : index
    %0 = vector.load %arg0[%c0, %c0_0] : memref<2x16xf32, #tpu.memory_space<vmem>>, vector<2x16xf32>
    %c0_1 = arith.constant 0 : index
    %c0_2 = arith.constant 0 : index
    %1 = vector.load %arg1[%c0_1, %c0_2] : memref<16x128xf32, #tpu.memory_space<vmem>>, vector<16x128xf32>
    %c0_3 = arith.constant 0 : index
    %c0_4 = arith.constant 0 : index
    %2 = vector.load %arg2[%c0_3, %c0_4] : memref<1x64xf32, #tpu.memory_space<vmem>>, vector<1x64xf32>
    %c0_5 = arith.constant 0 : index
    %c0_6 = arith.constant 0 : index
    %3 = vector.load %arg3[%c0_5, %c0_6] : memref<64x64xf32, #tpu.memory_space<vmem>>, vector<64x64xf32>
    %c0_7 = arith.constant 0 : index
    %c0_8 = arith.constant 0 : index
    %4 = vector.load %arg4[%c0_7, %c0_8] : memref<1x32xf32, #tpu.memory_space<vmem>>, vector<1x32xf32>
    %c0_9 = arith.constant 0 : index
    %c0_10 = arith.constant 0 : index
    %5 = vector.load %arg5[%c0_9, %c0_10] : memref<32x2xf32, #tpu.memory_space<vmem>>, vector<32x2xf32>
    %c0_11 = arith.constant 0 : index
    %c0_12 = arith.constant 0 : index
    %6 = vector.load %arg6[%c0_11, %c0_12] : memref<1x2xf32, #tpu.memory_space<vmem>>, vector<1x2xf32>
    %cst = arith.constant dense<0.000000e+00> : vector<2x128xf32>
    %7 = tpu.matmul %0, %1, %cst {dimension_numbers = #tpu.dot_dimension_numbers<[1], [0], [0], [1], [0, 0, 1, 1], [], []>} : vector<2x16xf32>, vector<16x128xf32>, vector<2x128xf32> -> vector<2x128xf32>
    %8 = vector.extract_strided_slice %7 {offsets = [0, 0], sizes = [2, 64], strides = [1, 1]} : vector<2x128xf32> to vector<2x64xf32>
    %9 = vector.extract_strided_slice %7 {offsets = [0, 64], sizes = [2, 64], strides = [1, 1]} : vector<2x128xf32> to vector<2x64xf32>
    %10 = arith.maximumf %8, %9 : vector<2x64xf32>
    %11 = vector.broadcast %2 : vector<1x64xf32> to vector<2x64xf32>
    %12 = arith.addf %10, %11 : vector<2x64xf32>
    %cst_13 = arith.constant 0.000000e+00 : f32
    %13 = vector.broadcast %cst_13 : f32 to vector<2x64xf32>
    %cst_14 = arith.constant 1.500000e+00 : f32
    %14 = vector.broadcast %cst_14 : f32 to vector<2x64xf32>
    %15 = arith.cmpf ogt, %13, %14 : vector<2x64xf32>
    %16 = arith.extui %15 : vector<2x64xi1> to vector<2x64xi32>
    %17 = arith.sitofp %16 : vector<2x64xi32> to vector<2x64xf32>
    %cst_15 = arith.constant 0.899999976 : f32
    %18 = vector.broadcast %cst_15 : f32 to vector<2x64xf32>
    %19 = arith.mulf %18, %13 : vector<2x64xf32>
    %20 = arith.addf %19, %12 : vector<2x64xf32>
    %cst_16 = arith.constant 1.500000e+00 : f32
    %21 = vector.broadcast %cst_16 : f32 to vector<2x64xf32>
    %22 = arith.mulf %17, %21 : vector<2x64xf32>
    %23 = arith.subf %20, %22 : vector<2x64xf32>
    %cst_17 = arith.constant 1.500000e+00 : f32
    %24 = vector.broadcast %cst_17 : f32 to vector<2x64xf32>
    %25 = arith.cmpf ogt, %23, %24 : vector<2x64xf32>
    %26 = arith.extui %25 : vector<2x64xi1> to vector<2x64xi32>
    %27 = arith.sitofp %26 : vector<2x64xi32> to vector<2x64xf32>
    %cst_18 = arith.constant 1.500000e+00 : f32
    %28 = vector.broadcast %cst_18 : f32 to vector<2x64xf32>
    %29 = arith.cmpf ogt, %23, %28 : vector<2x64xf32>
    %30 = arith.extui %29 : vector<2x64xi1> to vector<2x64xi32>
    %31 = arith.sitofp %30 : vector<2x64xi32> to vector<2x64xf32>
    %cst_19 = arith.constant 0.899999976 : f32
    %32 = vector.broadcast %cst_19 : f32 to vector<2x64xf32>
    %33 = arith.mulf %32, %23 : vector<2x64xf32>
    %34 = arith.addf %33, %12 : vector<2x64xf32>
    %cst_20 = arith.constant 1.500000e+00 : f32
    %35 = vector.broadcast %cst_20 : f32 to vector<2x64xf32>
    %36 = arith.mulf %31, %35 : vector<2x64xf32>
    %37 = arith.subf %34, %36 : vector<2x64xf32>
    %cst_21 = arith.constant 1.500000e+00 : f32
    %38 = vector.broadcast %cst_21 : f32 to vector<2x64xf32>
    %39 = arith.cmpf ogt, %37, %38 : vector<2x64xf32>
    %40 = arith.extui %39 : vector<2x64xi1> to vector<2x64xi32>
    %41 = arith.sitofp %40 : vector<2x64xi32> to vector<2x64xf32>
    %cst_22 = arith.constant 1.500000e+00 : f32
    %42 = vector.broadcast %cst_22 : f32 to vector<2x64xf32>
    %43 = arith.cmpf ogt, %37, %42 : vector<2x64xf32>
    %44 = arith.extui %43 : vector<2x64xi1> to vector<2x64xi32>
    %45 = arith.sitofp %44 : vector<2x64xi32> to vector<2x64xf32>
    %cst_23 = arith.constant 0.899999976 : f32
    %46 = vector.broadcast %cst_23 : f32 to vector<2x64xf32>
    %47 = arith.mulf %46, %37 : vector<2x64xf32>
    %48 = arith.addf %47, %12 : vector<2x64xf32>
    %cst_24 = arith.constant 1.500000e+00 : f32
    %49 = vector.broadcast %cst_24 : f32 to vector<2x64xf32>
    %50 = arith.mulf %45, %49 : vector<2x64xf32>
    %51 = arith.subf %48, %50 : vector<2x64xf32>
    %cst_25 = arith.constant 1.500000e+00 : f32
    %52 = vector.broadcast %cst_25 : f32 to vector<2x64xf32>
    %53 = arith.cmpf ogt, %51, %52 : vector<2x64xf32>
    %54 = arith.extui %53 : vector<2x64xi1> to vector<2x64xi32>
    %55 = arith.sitofp %54 : vector<2x64xi32> to vector<2x64xf32>
    %cst_26 = arith.constant 1.500000e+00 : f32
    %56 = vector.broadcast %cst_26 : f32 to vector<2x64xf32>
    %57 = arith.cmpf ogt, %51, %56 : vector<2x64xf32>
    %58 = arith.extui %57 : vector<2x64xi1> to vector<2x64xi32>
    %59 = arith.sitofp %58 : vector<2x64xi32> to vector<2x64xf32>
    %cst_27 = arith.constant 0.899999976 : f32
    %60 = vector.broadcast %cst_27 : f32 to vector<2x64xf32>
    %61 = arith.mulf %60, %51 : vector<2x64xf32>
    %62 = arith.addf %61, %12 : vector<2x64xf32>
    %cst_28 = arith.constant 1.500000e+00 : f32
    %63 = vector.broadcast %cst_28 : f32 to vector<2x64xf32>
    %64 = arith.mulf %59, %63 : vector<2x64xf32>
    %65 = arith.subf %62, %64 : vector<2x64xf32>
    %cst_29 = arith.constant 1.500000e+00 : f32
    %66 = vector.broadcast %cst_29 : f32 to vector<2x64xf32>
    %67 = arith.cmpf ogt, %65, %66 : vector<2x64xf32>
    %68 = arith.extui %67 : vector<2x64xi1> to vector<2x64xi32>
    %69 = arith.sitofp %68 : vector<2x64xi32> to vector<2x64xf32>
    %cst_30 = arith.constant 1.500000e+00 : f32
    %70 = vector.broadcast %cst_30 : f32 to vector<2x64xf32>
    %71 = arith.cmpf ogt, %65, %70 : vector<2x64xf32>
    %72 = arith.extui %71 : vector<2x64xi1> to vector<2x64xi32>
    %73 = arith.sitofp %72 : vector<2x64xi32> to vector<2x64xf32>
    %cst_31 = arith.constant 0.899999976 : f32
    %74 = vector.broadcast %cst_31 : f32 to vector<2x64xf32>
    %75 = arith.mulf %74, %65 : vector<2x64xf32>
    %76 = arith.addf %75, %12 : vector<2x64xf32>
    %cst_32 = arith.constant 1.500000e+00 : f32
    %77 = vector.broadcast %cst_32 : f32 to vector<2x64xf32>
    %78 = arith.mulf %73, %77 : vector<2x64xf32>
    %79 = arith.subf %76, %78 : vector<2x64xf32>
    %cst_33 = arith.constant 1.500000e+00 : f32
    %80 = vector.broadcast %cst_33 : f32 to vector<2x64xf32>
    %81 = arith.cmpf ogt, %79, %80 : vector<2x64xf32>
    %82 = arith.extui %81 : vector<2x64xi1> to vector<2x64xi32>
    %83 = arith.sitofp %82 : vector<2x64xi32> to vector<2x64xf32>
    %cst_34 = arith.constant 1.500000e+00 : f32
    %84 = vector.broadcast %cst_34 : f32 to vector<2x64xf32>
    %85 = arith.cmpf ogt, %79, %84 : vector<2x64xf32>
    %86 = arith.extui %85 : vector<2x64xi1> to vector<2x64xi32>
    %87 = arith.sitofp %86 : vector<2x64xi32> to vector<2x64xf32>
    %cst_35 = arith.constant 0.899999976 : f32
    %88 = vector.broadcast %cst_35 : f32 to vector<2x64xf32>
    %89 = arith.mulf %88, %79 : vector<2x64xf32>
    %90 = arith.addf %89, %12 : vector<2x64xf32>
    %cst_36 = arith.constant 1.500000e+00 : f32
    %91 = vector.broadcast %cst_36 : f32 to vector<2x64xf32>
    %92 = arith.mulf %87, %91 : vector<2x64xf32>
    %93 = arith.subf %90, %92 : vector<2x64xf32>
    %cst_37 = arith.constant 1.500000e+00 : f32
    %94 = vector.broadcast %cst_37 : f32 to vector<2x64xf32>
    %95 = arith.cmpf ogt, %93, %94 : vector<2x64xf32>
    %96 = arith.extui %95 : vector<2x64xi1> to vector<2x64xi32>
    %97 = arith.sitofp %96 : vector<2x64xi32> to vector<2x64xf32>
    %cst_38 = arith.constant 1.500000e+00 : f32
    %98 = vector.broadcast %cst_38 : f32 to vector<2x64xf32>
    %99 = arith.cmpf ogt, %93, %98 : vector<2x64xf32>
    %100 = arith.extui %99 : vector<2x64xi1> to vector<2x64xi32>
    %101 = arith.sitofp %100 : vector<2x64xi32> to vector<2x64xf32>
    %cst_39 = arith.constant 0.899999976 : f32
    %102 = vector.broadcast %cst_39 : f32 to vector<2x64xf32>
    %103 = arith.mulf %102, %93 : vector<2x64xf32>
    %104 = arith.addf %103, %12 : vector<2x64xf32>
    %cst_40 = arith.constant 1.500000e+00 : f32
    %105 = vector.broadcast %cst_40 : f32 to vector<2x64xf32>
    %106 = arith.mulf %101, %105 : vector<2x64xf32>
    %107 = arith.subf %104, %106 : vector<2x64xf32>
    %cst_41 = arith.constant 1.500000e+00 : f32
    %108 = vector.broadcast %cst_41 : f32 to vector<2x64xf32>
    %109 = arith.cmpf ogt, %107, %108 : vector<2x64xf32>
    %110 = arith.extui %109 : vector<2x64xi1> to vector<2x64xi32>
    %111 = arith.sitofp %110 : vector<2x64xi32> to vector<2x64xf32>
    %cst_42 = arith.constant 1.500000e+00 : f32
    %112 = vector.broadcast %cst_42 : f32 to vector<2x64xf32>
    %113 = arith.cmpf ogt, %107, %112 : vector<2x64xf32>
    %114 = arith.extui %113 : vector<2x64xi1> to vector<2x64xi32>
    %115 = arith.sitofp %114 : vector<2x64xi32> to vector<2x64xf32>
    %cst_43 = arith.constant 0.899999976 : f32
    %116 = vector.broadcast %cst_43 : f32 to vector<2x64xf32>
    %117 = arith.mulf %116, %107 : vector<2x64xf32>
    %118 = arith.addf %117, %12 : vector<2x64xf32>
    %cst_44 = arith.constant 1.500000e+00 : f32
    %119 = vector.broadcast %cst_44 : f32 to vector<2x64xf32>
    %120 = arith.mulf %115, %119 : vector<2x64xf32>
    %121 = arith.subf %118, %120 : vector<2x64xf32>
    %cst_45 = arith.constant 1.500000e+00 : f32
    %122 = vector.broadcast %cst_45 : f32 to vector<2x64xf32>
    %123 = arith.cmpf ogt, %121, %122 : vector<2x64xf32>
    %124 = arith.extui %123 : vector<2x64xi1> to vector<2x64xi32>
    %125 = arith.sitofp %124 : vector<2x64xi32> to vector<2x64xf32>
    %126 = tpu.concatenate %27, %41, %55, %69, %83, %97, %111, %125 in 0 : vector<2x64xf32>, vector<2x64xf32>, vector<2x64xf32>, vector<2x64xf32>, vector<2x64xf32>, vector<2x64xf32>, vector<2x64xf32>, vector<2x64xf32> -> vector<16x64xf32>
    %cst_46 = arith.constant dense<0.000000e+00> : vector<16x64xf32>
    %127 = tpu.matmul %126, %3, %cst_46 {dimension_numbers = #tpu.dot_dimension_numbers<[1], [0], [0], [1], [0, 0, 1, 1], [], []>} : vector<16x64xf32>, vector<64x64xf32>, vector<16x64xf32> -> vector<16x64xf32>
    %128 = vector.extract_strided_slice %127 {offsets = [0, 0], sizes = [16, 32], strides = [1, 1]} : vector<16x64xf32> to vector<16x32xf32>
    %129 = vector.extract_strided_slice %127 {offsets = [0, 32], sizes = [16, 32], strides = [1, 1]} : vector<16x64xf32> to vector<16x32xf32>
    %130 = arith.maximumf %128, %129 : vector<16x32xf32>
    %131 = vector.broadcast %4 : vector<1x32xf32> to vector<16x32xf32>
    %132 = arith.addf %130, %131 : vector<16x32xf32>
    %cst_47 = arith.constant 0.000000e+00 : f32
    %133 = vector.broadcast %cst_47 : f32 to vector<2x32xf32>
    %134 = vector.extract_strided_slice %132 {offsets = [0, 0], sizes = [2, 32], strides = [1, 1]} : vector<16x32xf32> to vector<2x32xf32>
    %cst_48 = arith.constant 1.000000e+00 : f32
    %135 = vector.broadcast %cst_48 : f32 to vector<2x32xf32>
    %136 = arith.cmpf ogt, %133, %135 : vector<2x32xf32>
    %137 = arith.extui %136 : vector<2x32xi1> to vector<2x32xi32>
    %138 = arith.sitofp %137 : vector<2x32xi32> to vector<2x32xf32>
    %cst_49 = arith.constant 0.899999976 : f32
    %139 = vector.broadcast %cst_49 : f32 to vector<2x32xf32>
    %140 = arith.mulf %139, %133 : vector<2x32xf32>
    %141 = arith.addf %140, %134 : vector<2x32xf32>
    %cst_50 = arith.constant 1.000000e+00 : f32
    %142 = vector.broadcast %cst_50 : f32 to vector<2x32xf32>
    %143 = arith.mulf %138, %142 : vector<2x32xf32>
    %144 = arith.subf %141, %143 : vector<2x32xf32>
    %cst_51 = arith.constant 1.000000e+00 : f32
    %145 = vector.broadcast %cst_51 : f32 to vector<2x32xf32>
    %146 = arith.cmpf ogt, %144, %145 : vector<2x32xf32>
    %147 = arith.extui %146 : vector<2x32xi1> to vector<2x32xi32>
    %148 = arith.sitofp %147 : vector<2x32xi32> to vector<2x32xf32>
    %149 = vector.extract_strided_slice %132 {offsets = [2, 0], sizes = [2, 32], strides = [1, 1]} : vector<16x32xf32> to vector<2x32xf32>
    %cst_52 = arith.constant 1.000000e+00 : f32
    %150 = vector.broadcast %cst_52 : f32 to vector<2x32xf32>
    %151 = arith.cmpf ogt, %144, %150 : vector<2x32xf32>
    %152 = arith.extui %151 : vector<2x32xi1> to vector<2x32xi32>
    %153 = arith.sitofp %152 : vector<2x32xi32> to vector<2x32xf32>
    %cst_53 = arith.constant 0.899999976 : f32
    %154 = vector.broadcast %cst_53 : f32 to vector<2x32xf32>
    %155 = arith.mulf %154, %144 : vector<2x32xf32>
    %156 = arith.addf %155, %149 : vector<2x32xf32>
    %cst_54 = arith.constant 1.000000e+00 : f32
    %157 = vector.broadcast %cst_54 : f32 to vector<2x32xf32>
    %158 = arith.mulf %153, %157 : vector<2x32xf32>
    %159 = arith.subf %156, %158 : vector<2x32xf32>
    %cst_55 = arith.constant 1.000000e+00 : f32
    %160 = vector.broadcast %cst_55 : f32 to vector<2x32xf32>
    %161 = arith.cmpf ogt, %159, %160 : vector<2x32xf32>
    %162 = arith.extui %161 : vector<2x32xi1> to vector<2x32xi32>
    %163 = arith.sitofp %162 : vector<2x32xi32> to vector<2x32xf32>
    %164 = vector.extract_strided_slice %132 {offsets = [4, 0], sizes = [2, 32], strides = [1, 1]} : vector<16x32xf32> to vector<2x32xf32>
    %cst_56 = arith.constant 1.000000e+00 : f32
    %165 = vector.broadcast %cst_56 : f32 to vector<2x32xf32>
    %166 = arith.cmpf ogt, %159, %165 : vector<2x32xf32>
    %167 = arith.extui %166 : vector<2x32xi1> to vector<2x32xi32>
    %168 = arith.sitofp %167 : vector<2x32xi32> to vector<2x32xf32>
    %cst_57 = arith.constant 0.899999976 : f32
    %169 = vector.broadcast %cst_57 : f32 to vector<2x32xf32>
    %170 = arith.mulf %169, %159 : vector<2x32xf32>
    %171 = arith.addf %170, %164 : vector<2x32xf32>
    %cst_58 = arith.constant 1.000000e+00 : f32
    %172 = vector.broadcast %cst_58 : f32 to vector<2x32xf32>
    %173 = arith.mulf %168, %172 : vector<2x32xf32>
    %174 = arith.subf %171, %173 : vector<2x32xf32>
    %cst_59 = arith.constant 1.000000e+00 : f32
    %175 = vector.broadcast %cst_59 : f32 to vector<2x32xf32>
    %176 = arith.cmpf ogt, %174, %175 : vector<2x32xf32>
    %177 = arith.extui %176 : vector<2x32xi1> to vector<2x32xi32>
    %178 = arith.sitofp %177 : vector<2x32xi32> to vector<2x32xf32>
    %179 = vector.extract_strided_slice %132 {offsets = [6, 0], sizes = [2, 32], strides = [1, 1]} : vector<16x32xf32> to vector<2x32xf32>
    %cst_60 = arith.constant 1.000000e+00 : f32
    %180 = vector.broadcast %cst_60 : f32 to vector<2x32xf32>
    %181 = arith.cmpf ogt, %174, %180 : vector<2x32xf32>
    %182 = arith.extui %181 : vector<2x32xi1> to vector<2x32xi32>
    %183 = arith.sitofp %182 : vector<2x32xi32> to vector<2x32xf32>
    %cst_61 = arith.constant 0.899999976 : f32
    %184 = vector.broadcast %cst_61 : f32 to vector<2x32xf32>
    %185 = arith.mulf %184, %174 : vector<2x32xf32>
    %186 = arith.addf %185, %179 : vector<2x32xf32>
    %cst_62 = arith.constant 1.000000e+00 : f32
    %187 = vector.broadcast %cst_62 : f32 to vector<2x32xf32>
    %188 = arith.mulf %183, %187 : vector<2x32xf32>
    %189 = arith.subf %186, %188 : vector<2x32xf32>
    %cst_63 = arith.constant 1.000000e+00 : f32
    %190 = vector.broadcast %cst_63 : f32 to vector<2x32xf32>
    %191 = arith.cmpf ogt, %189, %190 : vector<2x32xf32>
    %192 = arith.extui %191 : vector<2x32xi1> to vector<2x32xi32>
    %193 = arith.sitofp %192 : vector<2x32xi32> to vector<2x32xf32>
    %194 = vector.extract_strided_slice %132 {offsets = [8, 0], sizes = [2, 32], strides = [1, 1]} : vector<16x32xf32> to vector<2x32xf32>
    %cst_64 = arith.constant 1.000000e+00 : f32
    %195 = vector.broadcast %cst_64 : f32 to vector<2x32xf32>
    %196 = arith.cmpf ogt, %189, %195 : vector<2x32xf32>
    %197 = arith.extui %196 : vector<2x32xi1> to vector<2x32xi32>
    %198 = arith.sitofp %197 : vector<2x32xi32> to vector<2x32xf32>
    %cst_65 = arith.constant 0.899999976 : f32
    %199 = vector.broadcast %cst_65 : f32 to vector<2x32xf32>
    %200 = arith.mulf %199, %189 : vector<2x32xf32>
    %201 = arith.addf %200, %194 : vector<2x32xf32>
    %cst_66 = arith.constant 1.000000e+00 : f32
    %202 = vector.broadcast %cst_66 : f32 to vector<2x32xf32>
    %203 = arith.mulf %198, %202 : vector<2x32xf32>
    %204 = arith.subf %201, %203 : vector<2x32xf32>
    %cst_67 = arith.constant 1.000000e+00 : f32
    %205 = vector.broadcast %cst_67 : f32 to vector<2x32xf32>
    %206 = arith.cmpf ogt, %204, %205 : vector<2x32xf32>
    %207 = arith.extui %206 : vector<2x32xi1> to vector<2x32xi32>
    %208 = arith.sitofp %207 : vector<2x32xi32> to vector<2x32xf32>
    %209 = vector.extract_strided_slice %132 {offsets = [10, 0], sizes = [2, 32], strides = [1, 1]} : vector<16x32xf32> to vector<2x32xf32>
    %cst_68 = arith.constant 1.000000e+00 : f32
    %210 = vector.broadcast %cst_68 : f32 to vector<2x32xf32>
    %211 = arith.cmpf ogt, %204, %210 : vector<2x32xf32>
    %212 = arith.extui %211 : vector<2x32xi1> to vector<2x32xi32>
    %213 = arith.sitofp %212 : vector<2x32xi32> to vector<2x32xf32>
    %cst_69 = arith.constant 0.899999976 : f32
    %214 = vector.broadcast %cst_69 : f32 to vector<2x32xf32>
    %215 = arith.mulf %214, %204 : vector<2x32xf32>
    %216 = arith.addf %215, %209 : vector<2x32xf32>
    %cst_70 = arith.constant 1.000000e+00 : f32
    %217 = vector.broadcast %cst_70 : f32 to vector<2x32xf32>
    %218 = arith.mulf %213, %217 : vector<2x32xf32>
    %219 = arith.subf %216, %218 : vector<2x32xf32>
    %cst_71 = arith.constant 1.000000e+00 : f32
    %220 = vector.broadcast %cst_71 : f32 to vector<2x32xf32>
    %221 = arith.cmpf ogt, %219, %220 : vector<2x32xf32>
    %222 = arith.extui %221 : vector<2x32xi1> to vector<2x32xi32>
    %223 = arith.sitofp %222 : vector<2x32xi32> to vector<2x32xf32>
    %224 = vector.extract_strided_slice %132 {offsets = [12, 0], sizes = [2, 32], strides = [1, 1]} : vector<16x32xf32> to vector<2x32xf32>
    %cst_72 = arith.constant 1.000000e+00 : f32
    %225 = vector.broadcast %cst_72 : f32 to vector<2x32xf32>
    %226 = arith.cmpf ogt, %219, %225 : vector<2x32xf32>
    %227 = arith.extui %226 : vector<2x32xi1> to vector<2x32xi32>
    %228 = arith.sitofp %227 : vector<2x32xi32> to vector<2x32xf32>
    %cst_73 = arith.constant 0.899999976 : f32
    %229 = vector.broadcast %cst_73 : f32 to vector<2x32xf32>
    %230 = arith.mulf %229, %219 : vector<2x32xf32>
    %231 = arith.addf %230, %224 : vector<2x32xf32>
    %cst_74 = arith.constant 1.000000e+00 : f32
    %232 = vector.broadcast %cst_74 : f32 to vector<2x32xf32>
    %233 = arith.mulf %228, %232 : vector<2x32xf32>
    %234 = arith.subf %231, %233 : vector<2x32xf32>
    %cst_75 = arith.constant 1.000000e+00 : f32
    %235 = vector.broadcast %cst_75 : f32 to vector<2x32xf32>
    %236 = arith.cmpf ogt, %234, %235 : vector<2x32xf32>
    %237 = arith.extui %236 : vector<2x32xi1> to vector<2x32xi32>
    %238 = arith.sitofp %237 : vector<2x32xi32> to vector<2x32xf32>
    %239 = vector.extract_strided_slice %132 {offsets = [14, 0], sizes = [2, 32], strides = [1, 1]} : vector<16x32xf32> to vector<2x32xf32>
    %cst_76 = arith.constant 1.000000e+00 : f32
    %240 = vector.broadcast %cst_76 : f32 to vector<2x32xf32>
    %241 = arith.cmpf ogt, %234, %240 : vector<2x32xf32>
    %242 = arith.extui %241 : vector<2x32xi1> to vector<2x32xi32>
    %243 = arith.sitofp %242 : vector<2x32xi32> to vector<2x32xf32>
    %cst_77 = arith.constant 0.899999976 : f32
    %244 = vector.broadcast %cst_77 : f32 to vector<2x32xf32>
    %245 = arith.mulf %244, %234 : vector<2x32xf32>
    %246 = arith.addf %245, %239 : vector<2x32xf32>
    %cst_78 = arith.constant 1.000000e+00 : f32
    %247 = vector.broadcast %cst_78 : f32 to vector<2x32xf32>
    %248 = arith.mulf %243, %247 : vector<2x32xf32>
    %249 = arith.subf %246, %248 : vector<2x32xf32>
    %cst_79 = arith.constant 1.000000e+00 : f32
    %250 = vector.broadcast %cst_79 : f32 to vector<2x32xf32>
    %251 = arith.cmpf ogt, %249, %250 : vector<2x32xf32>
    %252 = arith.extui %251 : vector<2x32xi1> to vector<2x32xi32>
    %253 = arith.sitofp %252 : vector<2x32xi32> to vector<2x32xf32>
    %254 = tpu.concatenate %148, %163, %178, %193, %208, %223, %238, %253 in 0 : vector<2x32xf32>, vector<2x32xf32>, vector<2x32xf32>, vector<2x32xf32>, vector<2x32xf32>, vector<2x32xf32>, vector<2x32xf32>, vector<2x32xf32> -> vector<16x32xf32>
    %cst_80 = arith.constant dense<0.000000e+00> : vector<16x2xf32>
    %255 = tpu.matmul %254, %5, %cst_80 {dimension_numbers = #tpu.dot_dimension_numbers<[1], [0], [0], [1], [0, 0, 1, 1], [], []>} : vector<16x32xf32>, vector<32x2xf32>, vector<16x2xf32> -> vector<16x2xf32>
    %256 = vector.broadcast %6 : vector<1x2xf32> to vector<16x2xf32>
    %257 = arith.addf %255, %256 : vector<16x2xf32>
    %cst_81 = arith.constant 0.000000e+00 : f32
    %258 = vector.broadcast %cst_81 : f32 to vector<2x2xf32>
    %259 = vector.extract_strided_slice %257 {offsets = [0, 0], sizes = [2, 2], strides = [1, 1]} : vector<16x2xf32> to vector<2x2xf32>
    %cst_82 = arith.constant 1.000000e+00 : f32
    %260 = vector.broadcast %cst_82 : f32 to vector<2x2xf32>
    %261 = arith.cmpf ogt, %258, %260 : vector<2x2xf32>
    %262 = arith.extui %261 : vector<2x2xi1> to vector<2x2xi32>
    %263 = arith.sitofp %262 : vector<2x2xi32> to vector<2x2xf32>
    %cst_83 = arith.constant 0.899999976 : f32
    %264 = vector.broadcast %cst_83 : f32 to vector<2x2xf32>
    %265 = arith.mulf %264, %258 : vector<2x2xf32>
    %266 = arith.addf %265, %259 : vector<2x2xf32>
    %cst_84 = arith.constant 1.000000e+00 : f32
    %267 = vector.broadcast %cst_84 : f32 to vector<2x2xf32>
    %268 = arith.mulf %263, %267 : vector<2x2xf32>
    %269 = arith.subf %266, %268 : vector<2x2xf32>
    %cst_85 = arith.constant 1.000000e+00 : f32
    %270 = vector.broadcast %cst_85 : f32 to vector<2x2xf32>
    %271 = arith.cmpf ogt, %269, %270 : vector<2x2xf32>
    %272 = arith.extui %271 : vector<2x2xi1> to vector<2x2xi32>
    %273 = arith.sitofp %272 : vector<2x2xi32> to vector<2x2xf32>
    %274 = vector.extract_strided_slice %257 {offsets = [2, 0], sizes = [2, 2], strides = [1, 1]} : vector<16x2xf32> to vector<2x2xf32>
    %cst_86 = arith.constant 1.000000e+00 : f32
    %275 = vector.broadcast %cst_86 : f32 to vector<2x2xf32>
    %276 = arith.cmpf ogt, %269, %275 : vector<2x2xf32>
    %277 = arith.extui %276 : vector<2x2xi1> to vector<2x2xi32>
    %278 = arith.sitofp %277 : vector<2x2xi32> to vector<2x2xf32>
    %cst_87 = arith.constant 0.899999976 : f32
    %279 = vector.broadcast %cst_87 : f32 to vector<2x2xf32>
    %280 = arith.mulf %279, %269 : vector<2x2xf32>
    %281 = arith.addf %280, %274 : vector<2x2xf32>
    %cst_88 = arith.constant 1.000000e+00 : f32
    %282 = vector.broadcast %cst_88 : f32 to vector<2x2xf32>
    %283 = arith.mulf %278, %282 : vector<2x2xf32>
    %284 = arith.subf %281, %283 : vector<2x2xf32>
    %cst_89 = arith.constant 1.000000e+00 : f32
    %285 = vector.broadcast %cst_89 : f32 to vector<2x2xf32>
    %286 = arith.cmpf ogt, %284, %285 : vector<2x2xf32>
    %287 = arith.extui %286 : vector<2x2xi1> to vector<2x2xi32>
    %288 = arith.sitofp %287 : vector<2x2xi32> to vector<2x2xf32>
    %289 = vector.extract_strided_slice %257 {offsets = [4, 0], sizes = [2, 2], strides = [1, 1]} : vector<16x2xf32> to vector<2x2xf32>
    %cst_90 = arith.constant 1.000000e+00 : f32
    %290 = vector.broadcast %cst_90 : f32 to vector<2x2xf32>
    %291 = arith.cmpf ogt, %284, %290 : vector<2x2xf32>
    %292 = arith.extui %291 : vector<2x2xi1> to vector<2x2xi32>
    %293 = arith.sitofp %292 : vector<2x2xi32> to vector<2x2xf32>
    %cst_91 = arith.constant 0.899999976 : f32
    %294 = vector.broadcast %cst_91 : f32 to vector<2x2xf32>
    %295 = arith.mulf %294, %284 : vector<2x2xf32>
    %296 = arith.addf %295, %289 : vector<2x2xf32>
    %cst_92 = arith.constant 1.000000e+00 : f32
    %297 = vector.broadcast %cst_92 : f32 to vector<2x2xf32>
    %298 = arith.mulf %293, %297 : vector<2x2xf32>
    %299 = arith.subf %296, %298 : vector<2x2xf32>
    %cst_93 = arith.constant 1.000000e+00 : f32
    %300 = vector.broadcast %cst_93 : f32 to vector<2x2xf32>
    %301 = arith.cmpf ogt, %299, %300 : vector<2x2xf32>
    %302 = arith.extui %301 : vector<2x2xi1> to vector<2x2xi32>
    %303 = arith.sitofp %302 : vector<2x2xi32> to vector<2x2xf32>
    %304 = vector.extract_strided_slice %257 {offsets = [6, 0], sizes = [2, 2], strides = [1, 1]} : vector<16x2xf32> to vector<2x2xf32>
    %cst_94 = arith.constant 1.000000e+00 : f32
    %305 = vector.broadcast %cst_94 : f32 to vector<2x2xf32>
    %306 = arith.cmpf ogt, %299, %305 : vector<2x2xf32>
    %307 = arith.extui %306 : vector<2x2xi1> to vector<2x2xi32>
    %308 = arith.sitofp %307 : vector<2x2xi32> to vector<2x2xf32>
    %cst_95 = arith.constant 0.899999976 : f32
    %309 = vector.broadcast %cst_95 : f32 to vector<2x2xf32>
    %310 = arith.mulf %309, %299 : vector<2x2xf32>
    %311 = arith.addf %310, %304 : vector<2x2xf32>
    %cst_96 = arith.constant 1.000000e+00 : f32
    %312 = vector.broadcast %cst_96 : f32 to vector<2x2xf32>
    %313 = arith.mulf %308, %312 : vector<2x2xf32>
    %314 = arith.subf %311, %313 : vector<2x2xf32>
    %cst_97 = arith.constant 1.000000e+00 : f32
    %315 = vector.broadcast %cst_97 : f32 to vector<2x2xf32>
    %316 = arith.cmpf ogt, %314, %315 : vector<2x2xf32>
    %317 = arith.extui %316 : vector<2x2xi1> to vector<2x2xi32>
    %318 = arith.sitofp %317 : vector<2x2xi32> to vector<2x2xf32>
    %319 = vector.extract_strided_slice %257 {offsets = [8, 0], sizes = [2, 2], strides = [1, 1]} : vector<16x2xf32> to vector<2x2xf32>
    %cst_98 = arith.constant 1.000000e+00 : f32
    %320 = vector.broadcast %cst_98 : f32 to vector<2x2xf32>
    %321 = arith.cmpf ogt, %314, %320 : vector<2x2xf32>
    %322 = arith.extui %321 : vector<2x2xi1> to vector<2x2xi32>
    %323 = arith.sitofp %322 : vector<2x2xi32> to vector<2x2xf32>
    %cst_99 = arith.constant 0.899999976 : f32
    %324 = vector.broadcast %cst_99 : f32 to vector<2x2xf32>
    %325 = arith.mulf %324, %314 : vector<2x2xf32>
    %326 = arith.addf %325, %319 : vector<2x2xf32>
    %cst_100 = arith.constant 1.000000e+00 : f32
    %327 = vector.broadcast %cst_100 : f32 to vector<2x2xf32>
    %328 = arith.mulf %323, %327 : vector<2x2xf32>
    %329 = arith.subf %326, %328 : vector<2x2xf32>
    %cst_101 = arith.constant 1.000000e+00 : f32
    %330 = vector.broadcast %cst_101 : f32 to vector<2x2xf32>
    %331 = arith.cmpf ogt, %329, %330 : vector<2x2xf32>
    %332 = arith.extui %331 : vector<2x2xi1> to vector<2x2xi32>
    %333 = arith.sitofp %332 : vector<2x2xi32> to vector<2x2xf32>
    %334 = vector.extract_strided_slice %257 {offsets = [10, 0], sizes = [2, 2], strides = [1, 1]} : vector<16x2xf32> to vector<2x2xf32>
    %cst_102 = arith.constant 1.000000e+00 : f32
    %335 = vector.broadcast %cst_102 : f32 to vector<2x2xf32>
    %336 = arith.cmpf ogt, %329, %335 : vector<2x2xf32>
    %337 = arith.extui %336 : vector<2x2xi1> to vector<2x2xi32>
    %338 = arith.sitofp %337 : vector<2x2xi32> to vector<2x2xf32>
    %cst_103 = arith.constant 0.899999976 : f32
    %339 = vector.broadcast %cst_103 : f32 to vector<2x2xf32>
    %340 = arith.mulf %339, %329 : vector<2x2xf32>
    %341 = arith.addf %340, %334 : vector<2x2xf32>
    %cst_104 = arith.constant 1.000000e+00 : f32
    %342 = vector.broadcast %cst_104 : f32 to vector<2x2xf32>
    %343 = arith.mulf %338, %342 : vector<2x2xf32>
    %344 = arith.subf %341, %343 : vector<2x2xf32>
    %cst_105 = arith.constant 1.000000e+00 : f32
    %345 = vector.broadcast %cst_105 : f32 to vector<2x2xf32>
    %346 = arith.cmpf ogt, %344, %345 : vector<2x2xf32>
    %347 = arith.extui %346 : vector<2x2xi1> to vector<2x2xi32>
    %348 = arith.sitofp %347 : vector<2x2xi32> to vector<2x2xf32>
    %349 = vector.extract_strided_slice %257 {offsets = [12, 0], sizes = [2, 2], strides = [1, 1]} : vector<16x2xf32> to vector<2x2xf32>
    %cst_106 = arith.constant 1.000000e+00 : f32
    %350 = vector.broadcast %cst_106 : f32 to vector<2x2xf32>
    %351 = arith.cmpf ogt, %344, %350 : vector<2x2xf32>
    %352 = arith.extui %351 : vector<2x2xi1> to vector<2x2xi32>
    %353 = arith.sitofp %352 : vector<2x2xi32> to vector<2x2xf32>
    %cst_107 = arith.constant 0.899999976 : f32
    %354 = vector.broadcast %cst_107 : f32 to vector<2x2xf32>
    %355 = arith.mulf %354, %344 : vector<2x2xf32>
    %356 = arith.addf %355, %349 : vector<2x2xf32>
    %cst_108 = arith.constant 1.000000e+00 : f32
    %357 = vector.broadcast %cst_108 : f32 to vector<2x2xf32>
    %358 = arith.mulf %353, %357 : vector<2x2xf32>
    %359 = arith.subf %356, %358 : vector<2x2xf32>
    %cst_109 = arith.constant 1.000000e+00 : f32
    %360 = vector.broadcast %cst_109 : f32 to vector<2x2xf32>
    %361 = arith.cmpf ogt, %359, %360 : vector<2x2xf32>
    %362 = arith.extui %361 : vector<2x2xi1> to vector<2x2xi32>
    %363 = arith.sitofp %362 : vector<2x2xi32> to vector<2x2xf32>
    %364 = vector.extract_strided_slice %257 {offsets = [14, 0], sizes = [2, 2], strides = [1, 1]} : vector<16x2xf32> to vector<2x2xf32>
    %cst_110 = arith.constant 1.000000e+00 : f32
    %365 = vector.broadcast %cst_110 : f32 to vector<2x2xf32>
    %366 = arith.cmpf ogt, %359, %365 : vector<2x2xf32>
    %367 = arith.extui %366 : vector<2x2xi1> to vector<2x2xi32>
    %368 = arith.sitofp %367 : vector<2x2xi32> to vector<2x2xf32>
    %cst_111 = arith.constant 0.899999976 : f32
    %369 = vector.broadcast %cst_111 : f32 to vector<2x2xf32>
    %370 = arith.mulf %369, %359 : vector<2x2xf32>
    %371 = arith.addf %370, %364 : vector<2x2xf32>
    %cst_112 = arith.constant 1.000000e+00 : f32
    %372 = vector.broadcast %cst_112 : f32 to vector<2x2xf32>
    %373 = arith.mulf %368, %372 : vector<2x2xf32>
    %374 = arith.subf %371, %373 : vector<2x2xf32>
    %cst_113 = arith.constant 1.000000e+00 : f32
    %375 = vector.broadcast %cst_113 : f32 to vector<2x2xf32>
    %376 = arith.cmpf ogt, %374, %375 : vector<2x2xf32>
    %377 = arith.extui %376 : vector<2x2xi1> to vector<2x2xi32>
    %378 = arith.sitofp %377 : vector<2x2xi32> to vector<2x2xf32>
    %379 = tpu.concatenate %273, %288, %303, %318, %333, %348, %363, %378 in 0 : vector<2x2xf32>, vector<2x2xf32>, vector<2x2xf32>, vector<2x2xf32>, vector<2x2xf32>, vector<2x2xf32>, vector<2x2xf32>, vector<2x2xf32> -> vector<16x2xf32>
    %c0_114 = arith.constant 0 : index
    %c0_115 = arith.constant 0 : index
    %380 = vector.load %arg7[%c0_114, %c0_115] : memref<16x2xf32, #tpu.memory_space<vmem>>, vector<16x2xf32>
    tpu.vector_store %arg7[%c0_114, %c0_115], %379 {strides = array<i32>} : memref<16x2xf32, #tpu.memory_space<vmem>>, vector<16x2xf32>,
    %381 = tpu.concatenate %269, %284, %299, %314, %329, %344, %359, %374 in 0 : vector<2x2xf32>, vector<2x2xf32>, vector<2x2xf32>, vector<2x2xf32>, vector<2x2xf32>, vector<2x2xf32>, vector<2x2xf32>, vector<2x2xf32> -> vector<16x2xf32>
    %c0_116 = arith.constant 0 : index
    %c0_117 = arith.constant 0 : index
    %382 = vector.load %arg8[%c0_116, %c0_117] : memref<16x2xf32, #tpu.memory_space<vmem>>, vector<16x2xf32>
    tpu.vector_store %arg8[%c0_116, %c0_117], %381 {strides = array<i32>} : memref<16x2xf32, #tpu.memory_space<vmem>>, vector<16x2xf32>,
    return
  }
}

</mosaic_0001>

<bundles_post_ra>
// kernel: tpu_custom_call.1
= control target key start
LH: loop header
LB: loop body
LE: loop exit
PB: predicated region body
PF: predicated region fallthrough
CT: control target
= control target key end

     0   :  { %14 = vsyncpa [#allocation3], 0  ;;  %s777_s27 = smov [#allocation2]   ;;  %s941_s0 = inlined_call_operand.vmem [shape: f32[2,16], index: 0, kind: input, shape index: {}]   ;;  %s942_s1 = inlined_call_operand.vmem [shape: f32[16,128], index: 1, kind: input, shape index: {}]   ;;  %s943_s2 = inlined_call_operand.vmem [shape: f32[1,64], index: 2, kind: input, shape index: {}]   ;;  %s944_s3 = inlined_call_operand.hbm [shape: f32[64,64], index: 3, kind: input, shape index: {}]   ;;  %s945_s4 = inlined_call_operand.vmem [shape: f32[1,32], index: 4, kind: input, shape index: {}]   ;;  %s946_s5 = inlined_call_operand.vmem [shape: f32[32,2], index: 5, kind: input, shape index: {}]   ;;  %s947_s6 = inlined_call_operand.vmem [shape: f32[1,2], index: 6, kind: input, shape index: {}]   ;;  %s948_s7 = inlined_call_operand.vmem [shape: f32[16,2], index: 7, kind: output, shape index: {0}]   ;;  %s949_s8 = inlined_call_operand.vmem [shape: f32[16,2], index: 8, kind: output, shape index: {1}]  }
   0x1   :  { %s26_s28 = sshll.u32 %s777_s27, 4  ;;  %s753_s9 = scalar_lea.hbm %s944_s3, 1024  ;;  %s27_s28 = int_to_ptr.vmem [resolvable:$true] %s26_s28 }
   0x2   :  { %p754_p0 = scmp.ne.s32.totalorder %s944_s3, %s753_s9  ;;  %p757_p1 = scmp.lt.u32.totalorder %s753_s9, %s944_s3 }
   0x4   :  { %p759_p2 = pnand %p757_p1, %p754_p0 }
   0x6   :  { %762 = shalt.err (!%p759_p2)
}
   0x7   :  { %s763_s14 = scalar_lea.vmem %s27_s28, 1024  ;;  %p768_p4 = scmp.lt.s32.totalorder %s27_s28, %s27_s28 }
   0x8   :  { %p764_p3 = scmp.ne.s32.totalorder %s27_s28, %s763_s14  ;;  %p769_p5 = scmp.lt.s32.totalorder %s763_s14, %s763_s14 }
   0xa   :  { %p770_p6 = por %p769_p5, %p768_p4 }
   0xc   :  { %p771_p7 = pnand %p770_p6, %p764_p3 }
   0xe   :  { %774 = shalt.err (!%p771_p7)
}
   0xf   :  { %s778_s15 = smov 128   ;;  %s779_s16 = smov 8  }
  0x10   :  { %32 = dma.hbm_to_vmem [thread:$0]  %s944_s3, 1024, %s27_s28, [#allocation3], %s778_s15, %s778_s15, %s779_s16  }
  0x11   :  { %775 = dma.done.wait [#allocation3], 1024  }
  0x12   :  { %776 = vsyncadd [#allocation3], 4294966272  ;;  %v780_v0 = vmov 0.0|0.0   ;;  %vm781_vm0 = vmmov 0   ;;  %v782_v1 = vmov 0.0   ;;  %v43_v2 = vld [vmem:[%s942_s1] sm:$0xff] }
  0x13   :  { %718 = vmatprep.subr.bf16.mxu0 %v780_v0  ;;  %685 = vmatprep.mubr.msk.f32.mxu0 %vm781_vm0, %v782_v1  ;;  %v44_v3 = vld [vmem:[%s942_s1 + $0x8] sm:$0xff]  ;;  %v42_v5 = vld [vmem:[%s941_s0] sm:$0x3]  ;;  %vm60_vm1 = vcmask 130048   ;;  %s783_s24 = smov 64   ;;  %v48_v10 = vld [vmem:[#allocation2 + $0x10] sm:$0xff] }
  0x14   :  { %v719_v4 = vpack.c.bf16 %v44_v3, %v43_v2  ;;  %v46_v8 = vld [vmem:[#allocation2] sm:$0xff]  ;;  %v47_v9 = vld [vmem:[#allocation2 + $0x8] sm:$0xff]  ;;  %v49_v12 = vld [vmem:[#allocation2 + $0x18] sm:$0xff]  ;;  %vm222_vm5 = vcmask 1041408   ;;  %vm224_vm7 = vcmask 1043456   ;;  %vm226_vm8 = vcmask 1045504  }
  0x15   :  { %v721_v11 = vpack.c.bf16 %v47_v9, %v46_v8  ;;  %v725_v13 = vpack.c.bf16 %v49_v12, %v48_v10  ;;  %v50_v14 = vld [vmem:[#allocation2 + $0x20] sm:$0xff]  ;;  %v51_v15 = vld [vmem:[#allocation2 + $0x28] sm:$0xff]  ;;  %v52_v17 = vld [vmem:[#allocation2 + $0x30] sm:$0xff]  ;;  %vm231_vm9 = vcmask 523264  }
  0x16   :  { %720 = vmatpush3.bf16.msra.mxu0 %v719_v4  ;;  %v729_v16 = vpack.c.bf16 %v51_v15, %v50_v14  ;;  %v53_v18 = vld [vmem:[#allocation2 + $0x38] sm:$0xff]  ;;  %v631_v20 = vld [vmem:[%s943_s2] ss:$0 sm:$0xff]  ;;  %s784_s2 = smov 96   ;;  %v56_v12 = vld [vmem:[%s946_s5 + $0x8] sm:$0xff] }
  0x17   :  { %722 = vmatprep.subr.bf16.mxu1 %v721_v11  ;;  %v733_v19 = vpack.c.bf16 %v53_v18, %v52_v17  ;;  %v58_v15 = vld [vmem:[%s946_s5 + $0x18] sm:$0xff]  ;;  %v642_v17 = vld [vmem:[%s945_s4] ss:$0 sm:$0xff] }
  0x18   :  { %724 = vmatpush3.bf16.msra.mxu1 %v721_v11  ;;  %v55_v11 = vld [vmem:[%s946_s5] sm:$0xff] }
  0x19   :  { %686 = vmatmul.mubr.msk.f32.vlgmr.msra.gmra.mrb[0].mxu0 %vm60_vm1, %v42_v5  ;;  %726 = vmatprep.subr.bf16.mxu1 %v725_v13  ;;  %v737_v14 = vpack.c.bf16 %v56_v12, %v55_v11 }
  0x1b   :  { %738 = vmatprep.subr.bf16.mxu0 %v737_v14 }
  0x1c   :  { %728 = vmatpush3.bf16.msra.mxu1 %v725_v13  ;;  %v57_v13 = vld [vmem:[%s946_s5 + $0x10] sm:$0xff]  ;;  %740 = vmatpush3.bf16.msra.mxu0 %v737_v14 }
  0x1d   :  { %730 = vmatprep.subr.bf16.mxu1 %v729_v16 }
  0x20   :  { %732 = vmatpush3.bf16.msra.mxu1 %v729_v16  ;;  %v741_v16 = vpack.c.bf16 %v58_v15, %v57_v13 }
  0x21   :  { %734 = vmatprep.subr.bf16.mxu1 %v733_v19 }
  0x22   :  { %742 = vmatprep.subr.bf16.mxu0 %v741_v16 }
  0x23   :  { %744 = vmatpush3.bf16.msra.mxu0 %v741_v16 }
  0x24   :  { %736 = vmatpush3.bf16.msra.mxu1 %v733_v19 }
  0xec   :  { %v130_v6 = vpop.f32.mrb[0].mxu0 }
  0xed   :  { %135 = vrot.lane.b32.xlu0 %v130_v6, %s783_s24  ;;  %v687_v7 = vpop.f32.mrb[1].mxu0 }
 0x15f   :  { %v136_v21 = vpop.permute.xlu0 %135 }
 0x160   :  { %v138_v22 = vmax.f32 %v130_v6, %v136_v21 }
 0x162   :  { %v145_v23 = vadd.f32 %v631_v20, %v138_v22 }
 0x164   :  { %vm152_vm2 = vcmp.gt.f32.partialorder %v145_v23, 1.5  ;;  %v155_v24 = vmul.f32 0.9, %v145_v23 }
 0x165   :  { %v632_v25 = vsel %vm152_vm2, 1.0, %v782_v1  ;;  %vm425_vm2 = vcmask 261120  }
 0x166   :  { %v156_v26 = vadd.f32 %v155_v24, %v145_v23  ;;  %v157_v27 = vmul.f32 1.5, %v632_v25 }
 0x168   :  { %v158_v28 = vsub.f32 %v156_v26, %v157_v27 }
 0x16a   :  { %vm159_vm3 = vcmp.gt.f32.partialorder %v158_v28, 1.5  ;;  %v162_v29 = vmul.f32 0.9, %v158_v28 }
 0x16b   :  { %v633_v30 = vsel %vm159_vm3, 1.0, %v782_v1 }
 0x16c   :  { %v163_v31 = vadd.f32 %v162_v29, %v145_v23  ;;  %v164_v32 = vmul.f32 1.5, %v633_v30  ;;  %v205_v39 = vrot.slane %v633_v30, 6 }
 0x16e   :  { %v165_v33 = vsub.f32 %v163_v31, %v164_v32  ;;  %v223_v46 = vsel %vm222_vm5, %v632_v25, %v205_v39 }
 0x170   :  { %vm166_vm4 = vcmp.gt.f32.partialorder %v165_v33, 1.5  ;;  %v169_v34 = vmul.f32 0.9, %v165_v33 }
 0x171   :  { %v634_v35 = vsel %vm166_vm4, 1.0, %v782_v1 }
 0x172   :  { %v170_v36 = vadd.f32 %v169_v34, %v145_v23  ;;  %v171_v37 = vmul.f32 1.5, %v634_v35  ;;  %v208_v40 = vrot.slane %v634_v35, 4 }
 0x174   :  { %v172_v38 = vsub.f32 %v170_v36, %v171_v37  ;;  %v225_v47 = vsel %vm224_vm7, %v223_v46, %v208_v40 }
 0x176   :  { %vm173_vm6 = vcmp.gt.f32.partialorder %v172_v38, 1.5  ;;  %v176_v41 = vmul.f32 0.9, %v172_v38 }
 0x177   :  { %v635_v42 = vsel %vm173_vm6, 1.0, %v782_v1 }
 0x178   :  { %v177_v43 = vadd.f32 %v176_v41, %v145_v23  ;;  %v178_v44 = vmul.f32 1.5, %v635_v42  ;;  %v211_v45 = vrot.slane %v635_v42, 2 }
 0x17a   :  { %v179_v48 = vsub.f32 %v177_v43, %v178_v44  ;;  %v227_v49 = vsel %vm226_vm8, %v225_v47, %v211_v45 }
 0x17b   :  { %704 = vmatprep.mubr.msk.f32.mxu1 %vm231_vm9, %v227_v49 }
 0x17c   :  { %vm180_vm10 = vcmp.gt.f32.partialorder %v179_v48, 1.5  ;;  %v183_v50 = vmul.f32 0.9, %v179_v48 }
 0x17d   :  { %v636_v51 = vsel %vm180_vm10, 1.0, %v782_v1 }
 0x17e   :  { %v184_v52 = vadd.f32 %v183_v50, %v145_v23  ;;  %v185_v53 = vmul.f32 1.5, %v636_v51 }
 0x180   :  { %v186_v54 = vsub.f32 %v184_v52, %v185_v53 }
 0x182   :  { %vm187_vm11 = vcmp.gt.f32.partialorder %v186_v54, 1.5  ;;  %v190_v55 = vmul.f32 0.9, %v186_v54 }
 0x183   :  { %v637_v56 = vsel %vm187_vm11, 1.0, %v782_v1 }
 0x184   :  { %v191_v57 = vadd.f32 %v190_v55, %v145_v23  ;;  %v192_v58 = vmul.f32 1.5, %v637_v56  ;;  %v214_v2 = vrot.slane %v637_v56, 6 }
 0x186   :  { %v193_v59 = vsub.f32 %v191_v57, %v192_v58  ;;  %v228_v6 = vsel %vm222_vm5, %v636_v51, %v214_v2 }
 0x188   :  { %vm194_vm12 = vcmp.gt.f32.partialorder %v193_v59, 1.5  ;;  %v197_v60 = vmul.f32 0.9, %v193_v59 }
 0x189   :  { %v638_v61 = vsel %vm194_vm12, 1.0, %v782_v1 }
 0x18a   :  { %v198_v62 = vadd.f32 %v197_v60, %v145_v23  ;;  %v199_v63 = vmul.f32 1.5, %v638_v61  ;;  %v217_v3 = vrot.slane %v638_v61, 4 }
 0x18c   :  { %v200_v0 = vsub.f32 %v198_v62, %v199_v63  ;;  %v229_v7 = vsel %vm224_vm7, %v228_v6, %v217_v3 }
 0x18e   :  { %vm201_vm13 = vcmp.gt.f32.partialorder %v200_v0, 1.5 }
 0x18f   :  { %v639_v4 = vsel %vm201_vm13, 1.0, %v782_v1  ;;  %vm592_vm13 = vcmask 15360  }
 0x190   :  { %v220_v5 = vrot.slane %v639_v4, 2 }
 0x192   :  { %v230_v8 = vsel %vm226_vm8, %v229_v7, %v220_v5 }
 0x193   :  { %705 = vmatmul.mubr.msk.f32.vlgmr.msra.gmra.mrb[0].mxu1 %vm231_vm9, %v230_v8  ;;  %v651_v8 = vld [vmem:[%s947_s6] ss:$0 sm:$0xff] }
 0x266   :  { %v706_v9 = vpop.f32.mrb[0].mxu1 }
 0x267   :  { %317 = vrot.lane.b32.xlu1 %v706_v9, %s784_s2  ;;  %v304_v10 = vpop.f32.mrb[1].mxu1 }
 0x268   :  { %315 = vrot.lane.b32.xlu0 %v304_v10, %s784_s2 }
 0x2d9   :  { %v318_v31 = vpop.permute.xlu1 %317 }
 0x2da   :  { %v316_v18 = vpop.permute.xlu0 %315  ;;  %v322_v34 = vmax.f32 %v706_v9, %v318_v31 }
 0x2db   :  { %v321_v19 = vmax.f32 %v304_v10, %v316_v18 }
 0x2dc   :  { %v330_v40 = vadd.f32 %v642_v17, %v322_v34 }
 0x2dd   :  { %v329_v20 = vadd.f32 %v642_v17, %v321_v19 }
 0x2de   :  { %v372_v49 = vrot.slane %v330_v40, 2  ;;  %v380_v54 = vrot.slane %v330_v40, 4  ;;  %v388_v61 = vrot.slane %v330_v40, 6 }
 0x2df   :  { %v339_v21 = vmul.f32 0.9, %v329_v20  ;;  %v341_v22 = vrot.slane %v329_v20, 2  ;;  %vm336_vm14 = vcmp.gt.f32.partialorder %v329_v20, 1.0  ;;  %v349_v26 = vrot.slane %v329_v20, 4 }
 0x2e0   :  { %v643_v24 = vsel %vm336_vm14, 1.0, %v782_v1  ;;  %v357_v32 = vrot.slane %v329_v20, 6 }
 0x2e1   :  { %v343_v23 = vadd.f32 %v341_v22, %v339_v21 }
 0x2e3   :  { %v344_v25 = vsub.f32 %v343_v23, %v643_v24 }
 0x2e5   :  { %vm345_vm15 = vcmp.gt.f32.partialorder %v344_v25, 1.0  ;;  %v348_v27 = vmul.f32 0.9, %v344_v25 }
 0x2e6   :  { %v644_v29 = vsel %vm345_vm15, 1.0, %v782_v1 }
 0x2e7   :  { %v351_v28 = vadd.f32 %v349_v26, %v348_v27  ;;  %v396_v38 = vrot.slane %v644_v29, 6 }
 0x2e9   :  { %v352_v30 = vsub.f32 %v351_v28, %v644_v29  ;;  %v413_v45 = vsel %vm222_vm5, %v643_v24, %v396_v38 }
 0x2eb   :  { %vm353_vm0 = vcmp.gt.f32.partialorder %v352_v30, 1.0  ;;  %v356_v33 = vmul.f32 0.9, %v352_v30 }
 0x2ec   :  { %v645_v35 = vsel %vm353_vm0, 1.0, %v782_v1 }
 0x2ed   :  { %v359_v36 = vadd.f32 %v357_v32, %v356_v33  ;;  %v399_v39 = vrot.slane %v645_v35, 4 }
 0x2ef   :  { %v360_v37 = vsub.f32 %v359_v36, %v645_v35  ;;  %v414_v46 = vsel %vm224_vm7, %v413_v45, %v399_v39 }
 0x2f1   :  { %vm361_vm1 = vcmp.gt.f32.partialorder %v360_v37, 1.0  ;;  %v364_v41 = vmul.f32 0.9, %v360_v37 }
 0x2f2   :  { %v646_v42 = vsel %vm361_vm1, 1.0, %v782_v1 }
 0x2f3   :  { %v365_v43 = vadd.f32 %v364_v41, %v330_v40  ;;  %v402_v44 = vrot.slane %v646_v42, 2 }
 0x2f5   :  { %v366_v47 = vsub.f32 %v365_v43, %v646_v42  ;;  %v415_v48 = vsel %vm226_vm8, %v414_v46, %v402_v44 }
 0x2f6   :  { %715 = vmatprep.mubr.msk.f32.mxu0 %vm425_vm2, %v415_v48 }
 0x2f7   :  { %vm367_vm3 = vcmp.gt.f32.partialorder %v366_v47, 1.0  ;;  %v370_v50 = vmul.f32 0.9, %v366_v47 }
 0x2f8   :  { %v647_v52 = vsel %vm367_vm3, 1.0, %v782_v1 }
 0x2f9   :  { %v374_v51 = vadd.f32 %v372_v49, %v370_v50 }
 0x2fb   :  { %v375_v53 = vsub.f32 %v374_v51, %v647_v52 }
 0x2fd   :  { %vm376_vm4 = vcmp.gt.f32.partialorder %v375_v53, 1.0  ;;  %v379_v55 = vmul.f32 0.9, %v375_v53 }
 0x2fe   :  { %v648_v56 = vsel %vm376_vm4, 1.0, %v782_v1 }
 0x2ff   :  { %v382_v57 = vadd.f32 %v380_v54, %v379_v55  ;;  %v405_v58 = vrot.slane %v648_v56, 6 }
 0x301   :  { %v383_v59 = vsub.f32 %v382_v57, %v648_v56  ;;  %v416_v60 = vsel %vm222_vm5, %v647_v52, %v405_v58 }
 0x303   :  { %vm384_vm6 = vcmp.gt.f32.partialorder %v383_v59, 1.0  ;;  %v387_v62 = vmul.f32 0.9, %v383_v59 }
 0x304   :  { %v649_v63 = vsel %vm384_vm6, 1.0, %v782_v1 }
 0x305   :  { %v390_v0 = vadd.f32 %v388_v61, %v387_v62  ;;  %v408_v2 = vrot.slane %v649_v63, 4 }
 0x307   :  { %v391_v3 = vsub.f32 %v390_v0, %v649_v63  ;;  %v417_v4 = vsel %vm224_vm7, %v416_v60, %v408_v2 }
 0x309   :  { %vm392_vm9 = vcmp.gt.f32.partialorder %v391_v3, 1.0 }
 0x30a   :  { %v650_v5 = vsel %vm392_vm9, 1.0, %v782_v1 }
 0x30b   :  { %v411_v6 = vrot.slane %v650_v5, 2 }
 0x30d   :  { %v418_v7 = vsel %vm226_vm8, %v417_v4, %v411_v6 }
 0x30e   :  { %716 = vmatmul.mubr.msk.f32.vlgmr.msra.gmra.mrb[2].mxu0 %vm425_vm2, %v418_v7 }
 0x3e1   :  { %v717_v9 = vpop.f32.mrb[2].mxu0 }
 0x3e2   :  { %v498_v10 = vpop.f32.mrb[3].mxu0  ;;  %v504_v30 = vadd.f32 %v717_v9, %v651_v8 }
 0x3e3   :  { %v499_v11 = vadd.f32 %v651_v8, %v498_v10 }
 0x3e4   :  { %v545_v44 = vrot.slane %v504_v30, 2  ;;  %v553_v49 = vrot.slane %v504_v30, 4  ;;  %v561_v58 = vrot.slane %v504_v30, 6 }
 0x3e5   :  { %vm509_vm10 = vcmp.gt.f32.partialorder %v499_v11, 1.0  ;;  %v512_v12 = vmul.f32 0.9, %v499_v11  ;;  %v514_v13 = vrot.slane %v499_v11, 2  ;;  %v522_v18 = vrot.slane %v499_v11, 4 }
 0x3e6   :  { %v654_v15 = vsel %vm509_vm10, 1.0, %v782_v1  ;;  %v530_v23 = vrot.slane %v499_v11, 6 }
 0x3e7   :  { %v516_v14 = vadd.f32 %v514_v13, %v512_v12 }
 0x3e9   :  { %v517_v16 = vsub.f32 %v516_v14, %v654_v15 }
 0x3eb   :  { %vm518_vm11 = vcmp.gt.f32.partialorder %v517_v16, 1.0  ;;  %v521_v17 = vmul.f32 0.9, %v517_v16  ;;  %v596_v26 = vrot.slane %v517_v16, 6 }
 0x3ec   :  { %v655_v20 = vsel %vm518_vm11, 1.0, %v782_v1 }
 0x3ed   :  { %v524_v19 = vadd.f32 %v522_v18, %v521_v17  ;;  %v569_v29 = vrot.slane %v655_v20, 6  ;;  %v613_v34 = vsel %vm222_vm5, %v499_v11, %v596_v26 }
 0x3ef   :  { %v525_v21 = vsub.f32 %v524_v19, %v655_v20  ;;  %v586_v39 = vsel %vm222_vm5, %v654_v15, %v569_v29 }
 0x3f1   :  { %vm526_vm12 = vcmp.gt.f32.partialorder %v525_v21, 1.0  ;;  %v529_v22 = vmul.f32 0.9, %v525_v21  ;;  %v599_v27 = vrot.slane %v525_v21, 4 }
 0x3f2   :  { %v656_v24 = vsel %vm526_vm12, 1.0, %v782_v1 }
 0x3f3   :  { %v532_v25 = vadd.f32 %v530_v23, %v529_v22  ;;  %v572_v31 = vrot.slane %v656_v24, 4  ;;  %v614_v36 = vsel %vm224_vm7, %v613_v34, %v599_v27 }
 0x3f5   :  { %v533_v28 = vsub.f32 %v532_v25, %v656_v24  ;;  %v587_v41 = vsel %vm224_vm7, %v586_v39, %v572_v31 }
 0x3f7   :  { %vm534_vm14 = vcmp.gt.f32.partialorder %v533_v28, 1.0  ;;  %v537_v32 = vmul.f32 0.9, %v533_v28  ;;  %v602_v33 = vrot.slane %v533_v28, 2 }
 0x3f8   :  { %v657_v35 = vsel %vm534_vm14, 1.0, %v782_v1 }
 0x3f9   :  { %v538_v37 = vadd.f32 %v537_v32, %v504_v30  ;;  %v575_v38 = vrot.slane %v657_v35, 2  ;;  %v615_v40 = vsel %vm226_vm8, %v614_v36, %v602_v33 }
 0x3fa   :  { %619 = vst.msk [vmem:[%s949_s8] sm:$0xff] %vm592_vm13, %v615_v40 }
 0x3fb   :  { %v539_v42 = vsub.f32 %v538_v37, %v657_v35  ;;  %v588_v43 = vsel %vm226_vm8, %v587_v41, %v575_v38 }
 0x3fc   :  { %593 = vst.msk [vmem:[%s948_s7] sm:$0xff] %vm592_vm13, %v588_v43 }
 0x3fd   :  { %vm540_vm15 = vcmp.gt.f32.partialorder %v539_v42, 1.0  ;;  %v543_v45 = vmul.f32 0.9, %v539_v42 }
 0x3fe   :  { %v658_v47 = vsel %vm540_vm15, 1.0, %v782_v1 }
 0x3ff   :  { %v547_v46 = vadd.f32 %v545_v44, %v543_v45 }
 0x401   :  { %v548_v48 = vsub.f32 %v547_v46, %v658_v47 }
 0x403   :  { %vm549_vm0 = vcmp.gt.f32.partialorder %v548_v48, 1.0  ;;  %v552_v50 = vmul.f32 0.9, %v548_v48  ;;  %v605_v51 = vrot.slane %v548_v48, 6 }
 0x404   :  { %v659_v52 = vsel %vm549_vm0, 1.0, %v782_v1 }
 0x405   :  { %v555_v53 = vadd.f32 %v553_v49, %v552_v50  ;;  %v578_v54 = vrot.slane %v659_v52, 6  ;;  %v616_v55 = vsel %vm222_vm5, %v539_v42, %v605_v51 }
 0x407   :  { %v556_v56 = vsub.f32 %v555_v53, %v659_v52  ;;  %v589_v57 = vsel %vm222_vm5, %v658_v47, %v578_v54 }
 0x409   :  { %vm557_vm1 = vcmp.gt.f32.partialorder %v556_v56, 1.0  ;;  %v560_v59 = vmul.f32 0.9, %v556_v56  ;;  %v608_v60 = vrot.slane %v556_v56, 4 }
 0x40a   :  { %v660_v61 = vsel %vm557_vm1, 1.0, %v782_v1 }
 0x40b   :  { %v563_v62 = vadd.f32 %v561_v58, %v560_v59  ;;  %v581_v63 = vrot.slane %v660_v61, 4  ;;  %v617_v0 = vsel %vm224_vm7, %v616_v55, %v608_v60 }
 0x40d   :  { %v564_v2 = vsub.f32 %v563_v62, %v660_v61  ;;  %v590_v3 = vsel %vm224_vm7, %v589_v57, %v581_v63 }
 0x40f   :  { %vm565_vm2 = vcmp.gt.f32.partialorder %v564_v2, 1.0  ;;  %v611_v4 = vrot.slane %v564_v2, 2 }
 0x410   :  { %v661_v5 = vsel %vm565_vm2, 1.0, %v782_v1 }
 0x411   :  { %v584_v6 = vrot.slane %v661_v5, 2  ;;  %v618_v7 = vsel %vm226_vm8, %v617_v0, %v611_v4 }
 0x412   :  { %620 = vst.msk [vmem:[%s949_s8 + $0x8] sm:$0xff] %vm592_vm13, %v618_v7 }
 0x413   :  { %v591_v8 = vsel %vm226_vm8, %v590_v3, %v584_v6 }
 0x414   :  { %594 = vst.msk [vmem:[%s948_s7 + $0x8] sm:$0xff] %vm592_vm13, %v591_v8 }
 0x415   :  { %629 = vsyncpa [#allocation3], 1 }

</bundles_post_ra>
